<compile_context>
chip_gen: v7x
topology: tpu7x:2x2x1
jax: 0.10.0
libtpu: 0.0.40
codegen_flags: <defaults>
</compile_context>

<pallas_src>
import functools

import jax
import jax.numpy as jnp
from jax import lax
from jax.experimental import pallas as pl
from jax.experimental.pallas import tpu as pltpu


def poly_cutoff_kernel(x_ref, o_ref, *, factor, p):
    # x_ref / o_ref: (tile_rows, 128) float32 blocks of the flattened
    # (and padded) distance array.
    x = x_ref[...] * factor                      # scaled distance

    # Trace-time constants (hoisted out of the element-wise math).
    c0 = -(p + 1.0) * (p + 2.0) / 2.0
    c1 = p * (p + 2.0)
    c2 = -p * (p + 1.0) / 2.0

    # Single x^p; integer exponent -> repeated multiply on the VPU,
    # non-integer exponent -> pow (EUP). p is a Python float at trace time.
    if float(p).is_integer():
        xp = lax.integer_pow(x, int(p))
    else:
        xp = jnp.power(x, p)

    # Horner: 1 + x^p * (c0 + x*(c1 + c2*x))
    poly = 1.0 + xp * (c0 + x * (c1 + c2 * x))

    # Envelope is zero at/after the cutoff (xs >= 1).
    o_ref[...] = jnp.where(x < 1.0, poly, 0.0).astype(o_ref.dtype)


def polynomial_cutoff(x, r_max, p=6.0, *, tile_rows=512, lane_width=128):
    """Elementwise polynomial cutoff. x: any shape -> same shape, same dtype."""
    orig_shape = x.shape
    orig_dtype = x.dtype
    xf = jnp.asarray(x, dtype=jnp.float32).reshape(-1)
    n = xf.shape[0]
    if n == 0:
        return jnp.zeros(orig_shape, dtype=orig_dtype)

    # Choose a tile height no larger than what the input actually needs
    # (multiple of 8 sublanes), then pad the row count to a whole number of
    # tiles. Padded zeros are harmless (they evaluate to 1.0) and are sliced
    # off below.
    rows_needed = pl.cdiv(n, lane_width)
    tile_rows = min(int(tile_rows), ((rows_needed + 7) // 8) * 8)
    n_rows = pl.cdiv(rows_needed, tile_rows) * tile_rows
    n_pad = n_rows * lane_width
    if n_pad != n:
        xf = jnp.pad(xf, (0, n_pad - n))

    x2 = xf.reshape(n_rows, lane_width)
    grid = (n_rows // tile_rows,)

    kernel = functools.partial(
        poly_cutoff_kernel, factor=1.0 / float(r_max), p=float(p)
    )

    out2 = pl.pallas_call(
        kernel,
        out_shape=jax.ShapeDtypeStruct((n_rows, lane_width), jnp.float32),
        grid_spec=pltpu.PrefetchScalarGridSpec(
            num_scalar_prefetch=0,
            grid=grid,
            in_specs=[pl.BlockSpec((tile_rows, lane_width), lambda i: (i, 0))],
            out_specs=pl.BlockSpec((tile_rows, lane_width), lambda i: (i, 0)),
        ),
        compiler_params=pltpu.CompilerParams(
            dimension_semantics=("parallel",)
        ),
    )(x2)

    out = out2.reshape(-1)[:n].reshape(orig_shape)
    return out.astype(orig_dtype)


def polynomial_cutoff_ref(x, r_max, p=6.0):
    """Pure-JAX reference, written exactly like the PyTorch _poly_cutoff."""
    factor = 1.0 / float(r_max)
    p = float(p)
    xs = x.astype(jnp.float32) * factor
    out = 1.0
    out = out - (p + 1.0) * (p + 2.0) / 2.0 * jnp.power(xs, p)
    out = out + p * (p + 2.0) * jnp.power(xs, p + 1.0)
    out = out - p * (p + 1.0) / 2 * jnp.power(xs, p + 2.0)
    return out * (xs < 1.0)


if __name__ == "__main__":
    r_max = 4.0
    p = 6.0
    key = jax.random.PRNGKey(0)

    # Small flat edge-distance vector (non-multiple of the block size to
    # exercise padding) plus a slightly larger one that spans >1 grid step.
    for n_edges in (5000, 200_000):
        key, sub = jax.random.split(key)
        # Distances in [0, 1.5 * r_max] so both sides of the cutoff are hit.
        x = jax.random.uniform(
            sub, (n_edges,), dtype=jnp.float32, minval=0.0, maxval=1.5 * r_max
        )

        out = polynomial_cutoff(x, r_max, p)
        out = jax.block_until_ready(out)

        ref = polynomial_cutoff_ref(x, r_max, p)
        assert out.shape == x.shape
        assert out.dtype == x.dtype
        assert jnp.allclose(out, ref, atol=1e-5, rtol=1e-5), "mismatch vs reference"

    print("KERNEL_OK")
</pallas_src>

<mosaic_0001>
module attributes {stable_mosaic.version = 11 : i64} {
  func.func @poly_cutoff_kernel(%arg0: i32, %arg1: memref<40x128xf32, #tpu.memory_space<vmem>>, %arg2: memref<40x128xf32, #tpu.memory_space<vmem>>) attributes {dimension_semantics = [#tpu.dimension_semantics<parallel>], iteration_bounds = array<i64: 1>, scalar_prefetch = 0 : i64, scratch_operands = 0 : i64, tpu.core_type = #tpu.core_type<tc>, window_params = [{transform_indices = @transform_0, window_bounds = array<i64: 40, 128>}, {transform_indices = @transform_1, window_bounds = array<i64: 40, 128>}]} {
    %c0 = arith.constant 0 : index
    %c0_0 = arith.constant 0 : index
    %0 = vector.load %arg1[%c0, %c0_0] : memref<40x128xf32, #tpu.memory_space<vmem>>, vector<40x128xf32>
    %cst = arith.constant 2.500000e-01 : f32
    %1 = vector.broadcast %cst : f32 to vector<40x128xf32>
    %2 = arith.mulf %0, %1 : vector<40x128xf32>
    %3 = arith.mulf %2, %2 : vector<40x128xf32>
    %4 = arith.mulf %3, %3 : vector<40x128xf32>
    %5 = arith.mulf %3, %4 : vector<40x128xf32>
    %cst_1 = arith.constant -2.100000e+01 : f32
    %6 = vector.broadcast %cst_1 : f32 to vector<40x128xf32>
    %7 = arith.mulf %6, %2 : vector<40x128xf32>
    %cst_2 = arith.constant 4.800000e+01 : f32
    %8 = vector.broadcast %cst_2 : f32 to vector<40x128xf32>
    %9 = arith.addf %8, %7 : vector<40x128xf32>
    %10 = arith.mulf %2, %9 : vector<40x128xf32>
    %cst_3 = arith.constant -2.800000e+01 : f32
    %11 = vector.broadcast %cst_3 : f32 to vector<40x128xf32>
    %12 = arith.addf %11, %10 : vector<40x128xf32>
    %13 = arith.mulf %5, %12 : vector<40x128xf32>
    %cst_4 = arith.constant 1.000000e+00 : f32
    %14 = vector.broadcast %cst_4 : f32 to vector<40x128xf32>
    %15 = arith.addf %14, %13 : vector<40x128xf32>
    %cst_5 = arith.constant 1.000000e+00 : f32
    %16 = vector.broadcast %cst_5 : f32 to vector<40x128xf32>
    %17 = arith.cmpf olt, %2, %16 : vector<40x128xf32>
    %cst_6 = arith.constant 0.000000e+00 : f32
    %18 = vector.broadcast %cst_6 : f32 to vector<40x128xf32>
    %19 = arith.select %17, %15, %18 : vector<40x128xi1>, vector<40x128xf32>
    %c0_7 = arith.constant 0 : index
    %c0_8 = arith.constant 0 : index
    %20 = vector.load %arg2[%c0_7, %c0_8] : memref<40x128xf32, #tpu.memory_space<vmem>>, vector<40x128xf32>
    tpu.vector_store %arg2[%c0_7, %c0_8], %19 {strides = array<i32>} : memref<40x128xf32, #tpu.memory_space<vmem>>, vector<40x128xf32>,
    return
  }
  func.func @transform_0(%arg0: i32) -> (i32, i32) {
    %c0_i32 = arith.constant 0 : i32
    %c0_i32_0 = arith.constant 0 : i32
    return %arg0, %c0_i32 : i32, i32
  }
  func.func @transform_1(%arg0: i32) -> (i32, i32) {
    %c0_i32 = arith.constant 0 : i32
    %c0_i32_0 = arith.constant 0 : i32
    return %arg0, %c0_i32 : i32, i32
  }
}

</mosaic_0001>

<bundles_post_ra>
// kernel: tpu_custom_call.1
= control target key start
LH: loop header
LB: loop body
LE: loop exit
PB: predicated region body
PF: predicated region fallthrough
CT: control target
= control target key end

     0   :  { %6 = vsyncpa [#allocation3], 0  ;;  %s206_s0 = inlined_call_operand.hbm [shape: f32[40,128], index: 0, kind: input, shape index: {}]   ;;  %s207_s1 = inlined_call_operand.hbm [shape: f32[40,128], index: 1, kind: output, shape index: {}]  }
   0x1   :  { %7 = vsyncpa [#allocation4], 0  ;;  %s162_s6 = smov [#allocation2]   ;;  %s114_s10 = scalar_lea.hbm %s206_s0, 640 }
   0x2   :  { %s13_s7 = sshll.u32 %s162_s6, 4  ;;  %p115_p0 = scmp.ne.s32.totalorder %s206_s0, %s114_s10  ;;  %s14_s7 = int_to_ptr.vmem [resolvable:$true] %s13_s7 }
   0x3   :  { %p118_p1 = scmp.lt.u32.totalorder %s114_s10, %s206_s0 }
   0x5   :  { %p120_p2 = pnand %p118_p1, %p115_p0 }
   0x7   :  { %123 = shalt.err (!%p120_p2)
}
   0x8   :  { %s124_s15 = scalar_lea.vmem %s14_s7, 640  ;;  %p129_p4 = scmp.lt.s32.totalorder %s14_s7, %s14_s7 }
   0x9   :  { %p125_p3 = scmp.ne.s32.totalorder %s14_s7, %s124_s15  ;;  %p130_p5 = scmp.lt.s32.totalorder %s124_s15, %s124_s15 }
   0xb   :  { %p131_p6 = por %p130_p5, %p129_p4 }
   0xd   :  { %p132_p7 = pnand %p131_p6, %p125_p3 }
   0xf   :  { %135 = shalt.err (!%p132_p7)
}
  0x10   :  { %s163_s16 = smov 128   ;;  %s164_s17 = smov 8  }
  0x11   :  { %19 = dma.hbm_to_vmem [thread:$0]  %s206_s0, 640, %s14_s7, [#allocation3], %s163_s16, %s163_s16, %s164_s17  }
  0x12   :  { %158 = dma.done.wait [#allocation3], 640  }
  0x13   :  { %159 = vsyncadd [#allocation3], 4294966656  ;;  %v23_v0 = vld [vmem:[#allocation2] sm:$0xff]  ;;  %v24_v1 = vld [vmem:[#allocation2 + $0x8] sm:$0xff]  ;;  %s165_s0 = smov [#allocation5]  }
  0x14   :  { %v25_v2 = vld [vmem:[#allocation2 + $0x10] sm:$0xff]  ;;  %v28_v3 = vmul.f32 0.25, %v23_v0  ;;  %v29_v4 = vmul.f32 0.25, %v24_v1  ;;  %v26_v6 = vld [vmem:[#allocation2 + $0x18] sm:$0xff]  ;;  %v27_v7 = vld [vmem:[#allocation2 + $0x20] sm:$0xff]  ;;  %s98_s20 = sshll.u32 %s165_s0, 4  ;;  %s99_s20 = int_to_ptr.vmem [resolvable:$true] %s98_s20 }
  0x15   :  { %v30_v5 = vmul.f32 0.25, %v25_v2  ;;  %v31_v11 = vmul.f32 0.25, %v26_v6  ;;  %v32_v18 = vmul.f32 0.25, %v27_v7  ;;  %s136_s21 = scalar_lea.vmem %s99_s20, 640  ;;  %p141_p9 = scmp.lt.s32.totalorder %s99_s20, %s99_s20 }
  0x16   :  { %v33_v8 = vmul.f32 %v28_v3, %v28_v3  ;;  %v48_v9 = vmul.f32 -21.0, %v28_v3  ;;  %v34_v10 = vmul.f32 %v29_v4, %v29_v4  ;;  %v49_v12 = vmul.f32 -21.0, %v29_v4  ;;  %p137_p8 = scmp.ne.s32.totalorder %s99_s20, %s136_s21  ;;  %p142_p10 = scmp.lt.s32.totalorder %s136_s21, %s136_s21 }
  0x17   :  { %v35_v13 = vmul.f32 %v30_v5, %v30_v5  ;;  %v50_v14 = vmul.f32 -21.0, %v30_v5  ;;  %v36_v22 = vmul.f32 %v31_v11, %v31_v11  ;;  %v51_v26 = vmul.f32 -21.0, %v31_v11 }
  0x18   :  { %v38_v15 = vmul.f32 %v33_v8, %v33_v8  ;;  %v53_v16 = vadd.f32 48.0, %v48_v9  ;;  %v39_v17 = vmul.f32 %v34_v10, %v34_v10  ;;  %v54_v19 = vadd.f32 48.0, %v49_v12  ;;  %p143_p11 = por %p142_p10, %p141_p9 }
  0x19   :  { %v40_v20 = vmul.f32 %v35_v13, %v35_v13  ;;  %v55_v21 = vadd.f32 48.0, %v50_v14  ;;  %v41_v30 = vmul.f32 %v36_v22, %v36_v22  ;;  %v56_v32 = vadd.f32 48.0, %v51_v26 }
  0x1a   :  { %v43_v23 = vmul.f32 %v38_v15, %v33_v8  ;;  %v58_v24 = vmul.f32 %v53_v16, %v28_v3  ;;  %v44_v25 = vmul.f32 %v39_v17, %v34_v10  ;;  %v59_v27 = vmul.f32 %v54_v19, %v29_v4  ;;  %p144_p12 = pnand %p143_p11, %p137_p8 }
  0x1b   :  { %v45_v28 = vmul.f32 %v40_v20, %v35_v13  ;;  %v60_v29 = vmul.f32 %v55_v21, %v30_v5  ;;  %v37_v33 = vmul.f32 %v32_v18, %v32_v18  ;;  %v52_v36 = vmul.f32 -21.0, %v32_v18 }
  0x1c   :  { %v63_v31 = vadd.f32 -28.0, %v58_v24  ;;  %v64_v34 = vadd.f32 -28.0, %v59_v27  ;;  %v46_v38 = vmul.f32 %v41_v30, %v36_v22  ;;  %v61_v39 = vmul.f32 %v56_v32, %v31_v11 }
  0x1d   :  { %v65_v35 = vadd.f32 -28.0, %v60_v29  ;;  %v42_v40 = vmul.f32 %v37_v33, %v37_v33  ;;  %vm78_vm0 = vcmp.lt.f32.partialorder %v28_v3, 1.0  ;;  %v57_v43 = vadd.f32 48.0, %v52_v36 }
  0x1e   :  { %v68_v37 = vmul.f32 %v63_v31, %v43_v23  ;;  %v69_v41 = vmul.f32 %v64_v34, %v44_v25  ;;  %vm79_vm1 = vcmp.lt.f32.partialorder %v29_v4, 1.0  ;;  %vm80_vm2 = vcmp.lt.f32.partialorder %v30_v5, 1.0 }
  0x1f   :  { %v70_v42 = vmul.f32 %v65_v35, %v45_v28  ;;  %v66_v45 = vadd.f32 -28.0, %v61_v39  ;;  %v47_v48 = vmul.f32 %v42_v40, %v37_v33  ;;  %v62_v49 = vmul.f32 %v57_v43, %v32_v18 }
  0x20   :  { %v73_v44 = vadd.f32 1.0, %v68_v37  ;;  %v74_v46 = vadd.f32 1.0, %v69_v41  ;;  %vm81_vm3 = vcmp.lt.f32.partialorder %v31_v11, 1.0  ;;  %vm82_vm4 = vcmp.lt.f32.partialorder %v32_v18, 1.0 }
  0x21   :  { %v75_v47 = vadd.f32 1.0, %v70_v42  ;;  %v71_v51 = vmul.f32 %v66_v45, %v46_v38  ;;  %v67_v54 = vadd.f32 -28.0, %v62_v49 }
  0x22   :  { %v83_v50 = vsel %vm78_vm0, %v73_v44, 0.0  ;;  %v84_v52 = vsel %vm79_vm1, %v74_v46, 0.0 }
  0x23   :  { %88 = vst [vmem:[#allocation5] sm:$0xff] %v83_v50  ;;  %v85_v53 = vsel %vm80_vm2, %v75_v47, 0.0  ;;  %89 = vst [vmem:[#allocation5 + $0x8] sm:$0xff] %v84_v52  ;;  %v76_v55 = vadd.f32 1.0, %v71_v51  ;;  %v72_v56 = vmul.f32 %v67_v54, %v47_v48 }
  0x24   :  { %90 = vst [vmem:[#allocation5 + $0x10] sm:$0xff] %v85_v53 }
  0x25   :  { %v86_v57 = vsel %vm81_vm3, %v76_v55, 0.0  ;;  %v77_v58 = vadd.f32 1.0, %v72_v56 }
  0x26   :  { %91 = vst [vmem:[#allocation5 + $0x18] sm:$0xff] %v86_v57 }
  0x27   :  { %v87_v59 = vsel %vm82_vm4, %v77_v58, 0.0 }
  0x28   :  { %92 = vst [vmem:[#allocation5 + $0x20] sm:$0xff] %v87_v59 }
  0x29   :  { %147 = shalt.err (!%p144_p12)
}
  0x2a   :  { %s148_s24 = scalar_lea.hbm %s207_s1, 640 }
  0x2b   :  { %p149_p13 = scmp.ne.s32.totalorder %s207_s1, %s148_s24  ;;  %p152_p0 = scmp.lt.u32.totalorder %s148_s24, %s207_s1 }
  0x2d   :  { %p154_p1 = pnand %p152_p0, %p149_p13 }
  0x2f   :  { %157 = shalt.err (!%p154_p1)
}
  0x30   :  { %104 = dma.vmem_to_hbm [thread:$0]  %s99_s20, 640, %s207_s1, [#allocation4], %s163_s16, %s163_s16, %s164_s17  }
  0x31   :  { %160 = dma.done.wait [#allocation4], 640  }
  0x32   :  { %161 = vsyncadd [#allocation4], 4294966656 }
  0x33   :  { %108 = vsyncpa [#allocation3], 1 }
  0x34   :  { %109 = vsyncpa [#allocation4], 1 }

</bundles_post_ra>
